<compile_context>
chip_gen: v6e
topology: v6e:2x2x1
jax: 0.10.0
libtpu: 0.0.40
codegen_flags: <defaults>
</compile_context>

<pallas_src>
import functools

import jax
import jax.numpy as jnp
from jax.experimental import pallas as pl
from jax.experimental.pallas import tpu as pltpu

_VMEM_LIMIT = 48 * 1024 * 1024  # safe on v5e/v6e (128 MiB phys) and v7x (64 MiB phys)


# ----------------------------------------------------------------- utilities --

def _round_up(n, m):
    return ((n + m - 1) // m) * m


def _padded_n(n):
    # <= 512 nodes: a single (full) tile, pad rows to a sublane multiple;
    # larger graphs: pad to a multiple of 512 and use 256x512 bf16 A tiles
    # (fits comfortably inside v7x's tighter VMEM with double-buffering).
    return _round_up(n, 8) if n <= 512 else _round_up(n, 512)


def _gcn_tiles(n_pad):
    return (n_pad, n_pad) if n_pad <= 512 else (256, 512)


def _compiler_params(*semantics):
    return pltpu.CompilerParams(dimension_semantics=semantics,
                                vmem_limit_bytes=_VMEM_LIMIT)


def fold_batch_norm(w, b, gamma, beta, mean, var, eps=1e-5):
    # eval-mode BatchNorm1d folded into the preceding GraphConv weight/bias:
    #   BN(x) = (x - mean) * gamma / sqrt(var + eps) + beta
    scale = gamma * jax.lax.rsqrt(var + eps)
    return w * scale[None, :], (b - mean) * scale + beta


# ------------------------------------------------------------------- kernels --

def _gcn_layer_kernel(*refs, residual, project):
    # grid = (rows_of_A  [parallel],  k_reduction_over_neighbors  [arbitrary])
    if project:
        (a_ref, hk_ref, hi_ref, fw_ref, fb_ref,
         w_ref, b_ref, o_ref, acc_ref) = refs
    else:
        a_ref, hk_ref, hi_ref, w_ref, b_ref, o_ref, acc_ref = refs

    k = pl.program_id(1)

    @pl.when(k == 0)
    def _():
        acc_ref[...] = jnp.zeros_like(acc_ref)

    hk = hk_ref[...]                                   # [tk, d_in] bf16
    if project:
        # feature Linear fused into the first GraphConv layer
        hk = (jnp.dot(hk, fw_ref[...], preferred_element_type=jnp.float32)
              + fb_ref[...]).astype(jnp.bfloat16)
    hw = jnp.dot(hk, w_ref[...], preferred_element_type=jnp.float32)   # [tk, d_out]
    acc_ref[...] += jnp.dot(a_ref[...], hw.astype(jnp.bfloat16),
                            preferred_element_type=jnp.float32)

    @pl.when(k == pl.num_programs(1) - 1)
    def _():
        # BN already folded into w/b -> bias + ReLU + residual only.
        y = jnp.maximum(acc_ref[...] + b_ref[...], 0.0)
        if residual:
            hi = hi_ref[...]
            if project:
                hi = (jnp.dot(hi, fw_ref[...], preferred_element_type=jnp.float32)
                      + fb_ref[...])
            else:
                hi = hi.astype(jnp.float32)
            y = hi + y
        # TODO(synk): training-mode dropout / BN batch statistics not implemented (eval only).
        o_ref[...] = y.astype(o_ref.dtype)


def _mlp_readout_kernel(h_ref, w0_ref, b0_ref, w1_ref, b1_ref, w2_ref, b2_ref, o_ref):
    # MLPReadout (L=2): Linear+ReLU, Linear+ReLU, Linear -- fused in one call,
    # intermediates stay in registers, output is a lane-dense 128-wide slab.
    y = jnp.dot(h_ref[...], w0_ref[...], preferred_element_type=jnp.float32) + b0_ref[...]
    y = jnp.maximum(y, 0.0).astype(jnp.bfloat16)
    y = jnp.dot(y, w1_ref[...], preferred_element_type=jnp.float32) + b1_ref[...]
    y = jnp.maximum(y, 0.0).astype(jnp.bfloat16)
    y = jnp.dot(y, w2_ref[...], preferred_element_type=jnp.float32) + b2_ref[...]
    o_ref[...] = y


# ------------------------------------------------------------------ wrappers --

def gcn_layer(a_norm, h, w_fold, b_fold, *, residual, feat_w=None, feat_b=None):
    """One GraphConv layer on a padded dense normalized adjacency.

    a_norm: [Np, Np] bf16, h: [Np, d_in] bf16, w_fold: bf16 (BN folded), b_fold: f32.
    Optionally fuses the input feature Linear (feat_w bf16, feat_b f32)."""
    project = feat_w is not None
    n_pad = a_norm.shape[0]
    d_in = h.shape[1]
    d_out = w_fold.shape[1]
    tm, tk = _gcn_tiles(n_pad)
    grid = (n_pad // tm, n_pad // tk)

    in_specs = [
        pl.BlockSpec((tm, tk), lambda i, k: (i, k)),      # A_norm tile
        pl.BlockSpec((tk, d_in), lambda i, k: (k, 0)),    # h rows for this k tile
        pl.BlockSpec((tm, d_in), lambda i, k: (i, 0)),    # h rows for the residual
    ]
    args = [a_norm, h, h]
    if project:
        d_hidden = feat_w.shape[1]
        in_specs += [
            pl.BlockSpec((d_in, d_hidden), lambda i, k: (0, 0)),   # feature W (VMEM resident)
            pl.BlockSpec((1, d_hidden), lambda i, k: (0, 0)),      # feature b
        ]
        args += [feat_w, feat_b.reshape(1, -1)]
    in_specs += [
        pl.BlockSpec((w_fold.shape[0], d_out), lambda i, k: (0, 0)),  # layer W (VMEM resident)
        pl.BlockSpec((1, d_out), lambda i, k: (0, 0)),                # BN-folded bias
    ]
    args += [w_fold, b_fold.reshape(1, -1)]

    return pl.pallas_call(
        functools.partial(_gcn_layer_kernel, residual=residual, project=project),
        out_shape=jax.ShapeDtypeStruct((n_pad, d_out), jnp.bfloat16),
        grid=grid,
        in_specs=in_specs,
        out_specs=pl.BlockSpec((tm, d_out), lambda i, k: (i, 0)),
        scratch_shapes=[pltpu.VMEM((tm, d_out), jnp.float32)],
        compiler_params=_compiler_params("parallel", "arbitrary"),
    )(*args)


def mlp_readout(h, mlp_params, *, lane_pad=128):
    """Fused 3-layer MLP readout. h: [Np, D] bf16. Returns [Np, n_classes] f32."""
    (w0, b0), (w1, b1), (w2, b2) = mlp_params
    n_pad = h.shape[0]
    n_cls = w2.shape[1]
    n_cls_pad = _round_up(n_cls, lane_pad)
    # pad final weight/bias so the output store is lane-dense (128-wide), slice after
    w2p = jnp.zeros((w2.shape[0], n_cls_pad), w2.dtype).at[:, :n_cls].set(w2)
    b2p = jnp.zeros((n_cls_pad,), b2.dtype).at[:n_cls].set(b2)

    tm = n_pad if n_pad <= 512 else 512
    grid = (n_pad // tm,)

    def const(shape):
        return pl.BlockSpec(shape, lambda i: (0, 0))

    out = pl.pallas_call(
        _mlp_readout_kernel,
        out_shape=jax.ShapeDtypeStruct((n_pad, n_cls_pad), jnp.float32),
        grid=grid,
        in_specs=[
            pl.BlockSpec((tm, h.shape[1]), lambda i: (i, 0)),
            const(w0.shape), const((1, b0.shape[0])),
            const(w1.shape), const((1, b1.shape[0])),
            const(w2p.shape), const((1, b2p.shape[0])),
        ],
        out_specs=pl.BlockSpec((tm, n_cls_pad), lambda i: (i, 0)),
        compiler_params=_compiler_params("parallel"),
    )(h, w0, b0.reshape(1, -1), w1, b1.reshape(1, -1), w2p, b2p.reshape(1, -1))
    return out[:, :n_cls]


# --------------------------------------------------------------- parameters --

def _init_linear(key, d_in, d_out):
    k1, k2 = jax.random.split(key)
    bound = 1.0 / jnp.sqrt(d_in)
    w = jax.random.uniform(k1, (d_in, d_out), jnp.float32, -bound, bound)
    b = jax.random.uniform(k2, (d_out,), jnp.float32, -bound, bound)
    return w, b


def init_gcn_net_params(key, in_dim, hidden_dim, out_dim, n_layers, n_classes):
    n_keys = 1 + 2 * n_layers + 3
    keys = jax.random.split(key, n_keys)
    ki = iter(range(n_keys))

    params = {"feature": _init_linear(keys[next(ki)], in_dim, hidden_dim)}

    layers = []
    dims = [(hidden_dim, hidden_dim)] * (n_layers - 1) + [(hidden_dim, out_dim)]
    for di, do in dims:
        w, b = _init_linear(keys[next(ki)], di, do)
        kb = jax.random.split(keys[next(ki)], 4)
        layers.append(dict(
            w=w, b=b,
            gamma=jax.random.uniform(kb[0], (do,), jnp.float32, 0.5, 1.5),
            beta=0.1 * jax.random.normal(kb[1], (do,), jnp.float32),
            mean=0.1 * jax.random.normal(kb[2], (do,), jnp.float32),
            var=jax.random.uniform(kb[3], (do,), jnp.float32, 0.5, 1.5),
        ))
    params["layers"] = layers

    mlp_dims = [(out_dim, out_dim // 2), (out_dim // 2, out_dim // 4),
                (out_dim // 4, n_classes)]
    params["mlp"] = [_init_linear(keys[next(ki)], di, do) for di, do in mlp_dims]
    return params


# ------------------------------------------------------------------ forward --

def gcn_net_forward(a_norm, h, params, *, batch_norm=True, residual=True):
    """a_norm: [N, N] f32, h: [N, in_dim] f32. Returns [N, n_classes] f32 logits."""
    n = h.shape[0]
    n_pad = _padded_n(n)

    a = jnp.pad(a_norm, ((0, n_pad - n), (0, n_pad - n))).astype(jnp.bfloat16)
    x = jnp.pad(h, ((0, n_pad - n), (0, 0))).astype(jnp.bfloat16)

    feat_w, feat_b = params["feature"]
    feat_w = feat_w.astype(jnp.bfloat16)

    # Residual requires matching in/out widths per layer (true for this config:
    # hidden_dim == out_dim); other configs would need a projection.
    for li, lp in enumerate(params["layers"]):
        w, b = lp["w"], lp["b"]
        if batch_norm:
            w, b = fold_batch_norm(w, b, lp["gamma"], lp["beta"], lp["mean"], lp["var"])
        w = w.astype(jnp.bfloat16)
        if li == 0:
            x = gcn_layer(a, x, w, b, residual=residual,
                          feat_w=feat_w, feat_b=feat_b)
        else:
            x = gcn_layer(a, x, w, b, residual=residual)

    (w0, b0), (w1, b1), (w2, b2) = params["mlp"]
    logits = mlp_readout(
        x,
        [(w0.astype(jnp.bfloat16), b0),
         (w1.astype(jnp.bfloat16), b1),
         (w2.astype(jnp.bfloat16), b2)],
    )
    return logits[:n]


def gcn_net_forward_ref(a_norm, h, params, *, batch_norm=True, residual=True):
    # plain-JAX f32 reference (weights pre-quantized to bf16 to match the kernels)
    def q(v):
        return v.astype(jnp.bfloat16).astype(jnp.float32)

    a = q(a_norm)
    x = q(h)
    fw, fb = params["feature"]
    x = x @ q(fw) + fb
    for lp in params["layers"]:
        w, b = lp["w"], lp["b"]
        if batch_norm:
            w, b = fold_batch_norm(w, b, lp["gamma"], lp["beta"], lp["mean"], lp["var"])
        y = jnp.maximum(a @ (x @ q(w)) + b, 0.0)
        x = x + y if residual else y
    for i, (w, b) in enumerate(params["mlp"]):
        x = x @ q(w) + b
        if i < 2:
            x = jnp.maximum(x, 0.0)
    return x


# --------------------------------------------------------------------- main --

def build_normalized_adjacency(key, n_nodes):
    a = (jax.random.uniform(key, (n_nodes, n_nodes)) < 0.3).astype(jnp.float32)
    a = jnp.maximum(a, a.T)
    a = jnp.minimum(a + jnp.eye(n_nodes, dtype=jnp.float32), 1.0)
    deg = a.sum(axis=1)
    d_inv_sqrt = jax.lax.rsqrt(deg)
    return a * d_inv_sqrt[:, None] * d_inv_sqrt[None, :]


if __name__ == "__main__":
    key = jax.random.PRNGKey(0)
    k_graph, k_feat, k_params = jax.random.split(key, 3)

    N_NODES, IN_DIM, HIDDEN_DIM, OUT_DIM, N_LAYERS, N_CLASSES = 16, 8, 32, 32, 3, 2

    a_norm = build_normalized_adjacency(k_graph, N_NODES)
    h = jax.random.normal(k_feat, (N_NODES, IN_DIM), jnp.float32)
    params = init_gcn_net_params(k_params, IN_DIM, HIDDEN_DIM, OUT_DIM,
                                 N_LAYERS, N_CLASSES)

    out = jax.block_until_ready(
        gcn_net_forward(a_norm, h, params, batch_norm=True, residual=True))
    assert out.shape == (N_NODES, N_CLASSES), out.shape

    ref = gcn_net_forward_ref(a_norm, h, params, batch_norm=True, residual=True)
    max_err = float(jnp.max(jnp.abs(out - ref)))
    assert max_err < 0.25, f"max abs error vs reference: {max_err}"
    print("KERNEL_OK")
</pallas_src>

<mosaic_0001>
module attributes {stable_mosaic.version = 11 : i64} {
  func.func @_gcn_layer_kernel(%arg0: i32, %arg1: i32, %arg2: memref<16x16xbf16, #tpu.memory_space<vmem>>, %arg3: memref<16x8xbf16, #tpu.memory_space<vmem>>, %arg4: memref<16x8xbf16, #tpu.memory_space<vmem>>, %arg5: memref<8x32xbf16, #tpu.memory_space<vmem>>, %arg6: memref<1x32xf32, #tpu.memory_space<vmem>>, %arg7: memref<32x32xbf16, #tpu.memory_space<vmem>>, %arg8: memref<1x32xf32, #tpu.memory_space<vmem>>, %arg9: memref<16x32xbf16, #tpu.memory_space<vmem>>, %arg10: memref<16x32xf32, #tpu.memory_space<vmem>>) attributes {dimension_semantics = [#tpu.dimension_semantics<parallel>, #tpu.dimension_semantics<arbitrary>], iteration_bounds = array<i64: 1, 1>, scalar_prefetch = 0 : i64, scratch_operands = 1 : i64, tpu.core_type = #tpu.core_type<tc>, window_params = [{transform_indices = @transform_0, window_bounds = array<i64: 16, 16>}, {transform_indices = @transform_1, window_bounds = array<i64: 16, 8>}, {transform_indices = @transform_2, window_bounds = array<i64: 16, 8>}, {pipeline_mode = #tpu.pipeline_mode<synchronous>, transform_indices = @transform_3, window_bounds = array<i64: 8, 32>}, {pipeline_mode = #tpu.pipeline_mode<synchronous>, transform_indices = @transform_4, window_bounds = array<i64: 1, 32>}, {pipeline_mode = #tpu.pipeline_mode<synchronous>, transform_indices = @transform_5, window_bounds = array<i64: 32, 32>}, {pipeline_mode = #tpu.pipeline_mode<synchronous>, transform_indices = @transform_6, window_bounds = array<i64: 1, 32>}, {transform_indices = @transform_7, window_bounds = array<i64: 16, 32>}]} {
    %c0_i32 = arith.constant 0 : i32
    %0 = arith.cmpi eq, %arg1, %c0_i32 : i32
    %1 = arith.extui %0 : i1 to i32
    %c0_i32_0 = arith.constant 0 : i32
    %2 = arith.cmpi ne, %1, %c0_i32_0 : i32
    scf.if %2 {
      %cst_18 = arith.constant 0.000000e+00 : f32
      %21 = vector.broadcast %cst_18 : f32 to vector<16x32xf32>
      %c0_19 = arith.constant 0 : index
      %c0_20 = arith.constant 0 : index
      %22 = vector.load %arg10[%c0_19, %c0_20] : memref<16x32xf32, #tpu.memory_space<vmem>>, vector<16x32xf32>
      tpu.vector_store %arg10[%c0_19, %c0_20], %21 {strides = array<i32>} : memref<16x32xf32, #tpu.memory_space<vmem>>, vector<16x32xf32>,
    } else {
    }
    %c0 = arith.constant 0 : index
    %c0_1 = arith.constant 0 : index
    %3 = vector.load %arg3[%c0, %c0_1] : memref<16x8xbf16, #tpu.memory_space<vmem>>, vector<16x8xbf16>
    %c0_2 = arith.constant 0 : index
    %c0_3 = arith.constant 0 : index
    %4 = vector.load %arg5[%c0_2, %c0_3] : memref<8x32xbf16, #tpu.memory_space<vmem>>, vector<8x32xbf16>
    %cst = arith.constant dense<0.000000e+00> : vector<16x32xf32>
    %5 = tpu.matmul %3, %4, %cst {dimension_numbers = #tpu.dot_dimension_numbers<[1], [0], [0], [1], [0, 0, 1, 1], [], []>} : vector<16x8xbf16>, vector<8x32xbf16>, vector<16x32xf32> -> vector<16x32xf32>
    %c0_4 = arith.constant 0 : index
    %c0_5 = arith.constant 0 : index
    %6 = vector.load %arg6[%c0_4, %c0_5] : memref<1x32xf32, #tpu.memory_space<vmem>>, vector<1x32xf32>
    %7 = vector.broadcast %6 : vector<1x32xf32> to vector<16x32xf32>
    %8 = arith.addf %5, %7 : vector<16x32xf32>
    %9 = arith.truncf %8 : vector<16x32xf32> to vector<16x32xbf16>
    %c0_6 = arith.constant 0 : index
    %c0_7 = arith.constant 0 : index
    %10 = vector.load %arg7[%c0_6, %c0_7] : memref<32x32xbf16, #tpu.memory_space<vmem>>, vector<32x32xbf16>
    %cst_8 = arith.constant dense<0.000000e+00> : vector<16x32xf32>
    %11 = tpu.matmul %9, %10, %cst_8 {dimension_numbers = #tpu.dot_dimension_numbers<[1], [0], [0], [1], [0, 0, 1, 1], [], []>} : vector<16x32xbf16>, vector<32x32xbf16>, vector<16x32xf32> -> vector<16x32xf32>
    %c0_9 = arith.constant 0 : index
    %c0_10 = arith.constant 0 : index
    %12 = vector.load %arg10[%c0_9, %c0_10] : memref<16x32xf32, #tpu.memory_space<vmem>>, vector<16x32xf32>
    %c0_11 = arith.constant 0 : index
    %c0_12 = arith.constant 0 : index
    %13 = vector.load %arg2[%c0_11, %c0_12] : memref<16x16xbf16, #tpu.memory_space<vmem>>, vector<16x16xbf16>
    %14 = arith.truncf %11 : vector<16x32xf32> to vector<16x32xbf16>
    %cst_13 = arith.constant dense<0.000000e+00> : vector<16x32xf32>
    %15 = tpu.matmul %13, %14, %cst_13 {dimension_numbers = #tpu.dot_dimension_numbers<[1], [0], [0], [1], [0, 0, 1, 1], [], []>} : vector<16x16xbf16>, vector<16x32xbf16>, vector<16x32xf32> -> vector<16x32xf32>
    %16 = arith.addf %12, %15 : vector<16x32xf32>
    %c0_14 = arith.constant 0 : index
    %c0_15 = arith.constant 0 : index
    %17 = vector.load %arg10[%c0_14, %c0_15] : memref<16x32xf32, #tpu.memory_space<vmem>>, vector<16x32xf32>
    tpu.vector_store %arg10[%c0_14, %c0_15], %16 {strides = array<i32>} : memref<16x32xf32, #tpu.memory_space<vmem>>, vector<16x32xf32>,
    %c0_i32_16 = arith.constant 0 : i32
    %18 = arith.cmpi eq, %arg1, %c0_i32_16 : i32
    %19 = arith.extui %18 : i1 to i32
    %c0_i32_17 = arith.constant 0 : i32
    %20 = arith.cmpi ne, %19, %c0_i32_17 : i32
    scf.if %20 {
      %c0_18 = arith.constant 0 : index
      %c0_19 = arith.constant 0 : index
      %21 = vector.load %arg10[%c0_18, %c0_19] : memref<16x32xf32, #tpu.memory_space<vmem>>, vector<16x32xf32>
      %c0_20 = arith.constant 0 : index
      %c0_21 = arith.constant 0 : index
      %22 = vector.load %arg8[%c0_20, %c0_21] : memref<1x32xf32, #tpu.memory_space<vmem>>, vector<1x32xf32>
      %23 = vector.broadcast %22 : vector<1x32xf32> to vector<16x32xf32>
      %24 = arith.addf %21, %23 : vector<16x32xf32>
      %cst_22 = arith.constant 0.000000e+00 : f32
      %25 = vector.broadcast %cst_22 : f32 to vector<16x32xf32>
      %26 = arith.maximumf %24, %25 : vector<16x32xf32>
      %c0_23 = arith.constant 0 : index
      %c0_24 = arith.constant 0 : index
      %27 = vector.load %arg4[%c0_23, %c0_24] : memref<16x8xbf16, #tpu.memory_space<vmem>>, vector<16x8xbf16>
      %c0_25 = arith.constant 0 : index
      %c0_26 = arith.constant 0 : index
      %28 = vector.load %arg5[%c0_25, %c0_26] : memref<8x32xbf16, #tpu.memory_space<vmem>>, vector<8x32xbf16>
      %cst_27 = arith.constant dense<0.000000e+00> : vector<16x32xf32>
      %29 = tpu.matmul %27, %28, %cst_27 {dimension_numbers = #tpu.dot_dimension_numbers<[1], [0], [0], [1], [0, 0, 1, 1], [], []>} : vector<16x8xbf16>, vector<8x32xbf16>, vector<16x32xf32> -> vector<16x32xf32>
      %c0_28 = arith.constant 0 : index
      %c0_29 = arith.constant 0 : index
      %30 = vector.load %arg6[%c0_28, %c0_29] : memref<1x32xf32, #tpu.memory_space<vmem>>, vector<1x32xf32>
      %31 = vector.broadcast %30 : vector<1x32xf32> to vector<16x32xf32>
      %32 = arith.addf %29, %31 : vector<16x32xf32>
      %33 = arith.addf %32, %26 : vector<16x32xf32>
      %34 = arith.truncf %33 : vector<16x32xf32> to vector<16x32xbf16>
      %c0_30 = arith.constant 0 : index
      %c0_31 = arith.constant 0 : index
      %35 = vector.load %arg9[%c0_30, %c0_31] : memref<16x32xbf16, #tpu.memory_space<vmem>>, vector<16x32xbf16>
      tpu.vector_store %arg9[%c0_30, %c0_31], %34 {strides = array<i32>} : memref<16x32xbf16, #tpu.memory_space<vmem>>, vector<16x32xbf16>,
    } else {
    }
    return
  }
  func.func @transform_0(%arg0: i32, %arg1: i32) -> (i32, i32) {
    %c0_i32 = arith.constant 0 : i32
    return %arg0, %arg1 : i32, i32
  }
  func.func @transform_1(%arg0: i32, %arg1: i32) -> (i32, i32) {
    %c0_i32 = arith.constant 0 : i32
    %c0_i32_0 = arith.constant 0 : i32
    return %arg1, %c0_i32 : i32, i32
  }
  func.func @transform_2(%arg0: i32, %arg1: i32) -> (i32, i32) {
    %c0_i32 = arith.constant 0 : i32
    %c0_i32_0 = arith.constant 0 : i32
    return %arg0, %c0_i32 : i32, i32
  }
  func.func @transform_3(%arg0: i32, %arg1: i32) -> (i32, i32) {
    %c0_i32 = arith.constant 0 : i32
    %c0_i32_0 = arith.constant 0 : i32
    %c0_i32_1 = arith.constant 0 : i32
    return %c0_i32, %c0_i32_0 : i32, i32
  }
  func.func @transform_4(%arg0: i32, %arg1: i32) -> (i32, i32) {
    %c0_i32 = arith.constant 0 : i32
    %c0_i32_0 = arith.constant 0 : i32
    %c0_i32_1 = arith.constant 0 : i32
    return %c0_i32, %c0_i32_0 : i32, i32
  }
  func.func @transform_5(%arg0: i32, %arg1: i32) -> (i32, i32) {
    %c0_i32 = arith.constant 0 : i32
    %c0_i32_0 = arith.constant 0 : i32
    %c0_i32_1 = arith.constant 0 : i32
    return %c0_i32, %c0_i32_0 : i32, i32
  }
  func.func @transform_6(%arg0: i32, %arg1: i32) -> (i32, i32) {
    %c0_i32 = arith.constant 0 : i32
    %c0_i32_0 = arith.constant 0 : i32
    %c0_i32_1 = arith.constant 0 : i32
    return %c0_i32, %c0_i32_0 : i32, i32
  }
  func.func @transform_7(%arg0: i32, %arg1: i32) -> (i32, i32) {
    %c0_i32 = arith.constant 0 : i32
    %c0_i32_0 = arith.constant 0 : i32
    return %arg0, %c0_i32 : i32, i32
  }
}

</mosaic_0001>

<bundles_post_ra>
// kernel: tpu_custom_call.1
= control target key start
LH: loop header
LB: loop body
LE: loop exit
PB: predicated region body
PF: predicated region fallthrough
CT: control target
= control target key end

     0   :  { %vm54_vm0 = vcmask 1043456   ;;  %v410_v1 = vmov 0.0   ;;  %vm411_vm1 = vmmov 0   ;;  %vm50_vm2 = vcmask 64512   ;;  %s498_s0 = inlined_call_operand.vmem [shape: bf16[16,16], index: 0, kind: input, shape index: {}]   ;;  %s499_s1 = inlined_call_operand.vmem [shape: bf16[16,8], index: 1, kind: input, shape index: {}]   ;;  %s500_s2 = inlined_call_operand.vmem [shape: bf16[16,8], index: 2, kind: input, shape index: {}]   ;;  %s501_s3 = inlined_call_operand.vmem [shape: bf16[8,32], index: 3, kind: input, shape index: {}]   ;;  %s502_s4 = inlined_call_operand.vmem [shape: f32[1,32], index: 4, kind: input, shape index: {}]   ;;  %s503_s5 = inlined_call_operand.vmem [shape: bf16[32,32], index: 5, kind: input, shape index: {}]   ;;  %s504_s6 = inlined_call_operand.vmem [shape: f32[1,32], index: 6, kind: input, shape index: {}]   ;;  %s505_s7 = inlined_call_operand.hbm [shape: bf16[16,32], index: 7, kind: output, shape index: {}]  }
   0x1   :  { %v37_v0 = vld [vmem:[%s501_s3] sm:$0xf]  ;;  %352 = vmatprep.subr.bf16.mxu0 %v410_v1  ;;  %358 = vmatprep.subr.bf16.mxu1 %v410_v1 }
   0x2   :  { %v56_v2 = vsel %vm54_vm0, %v37_v0, 0  ;;  %v383_v3 = vld [vmem:[%s499_s1] sm:$0xff]   ;;  %354 = vmatprep.mubr.msk.bf16.mxu0 %vm411_vm1, %v410_v1  ;;  %362 = vmatprep.mubr.msk.bf16.mxu1 %vm411_vm1, %v410_v1 }
   0x3   :  { %353 = vmatpush3.bf16.msra.mxu0 %v56_v2 }
   0x4   :  { %366 = vmatprep.subr.bf16.mxu0 %v410_v1 }
   0x6   :  { %355 = vmatmul.mubr.msk.bf16.vlgmr.msra.gmra.mxu0 %vm50_vm2, %v383_v3 }
   0x7   :  { %12 = vsyncpa [#allocation4], 0  ;;  %368 = vmatprep.mubr.msk.bf16.mxu0 %vm411_vm1, %v410_v1  ;;  %v384_v4 = vld [vmem:[%s503_s5 + $0x8] sm:$0xff]   ;;  %v385_v5 = vld [vmem:[%s503_s5] sm:$0xff]   ;;  %vm32_vm3 = vcmask 261120   ;;  %vm171_vm4 = vcmask 130048  }
   0x8   :  { %359 = vmatpush3.bf16.msra.mxu1 %v384_v4  ;;  %33 = vst.msk [vmem:[#allocation2] sm:$0xff] %vm32_vm3, %v410_v1  ;;  %34 = vst.msk [vmem:[#allocation2 + $0x8] sm:$0xff] %vm32_vm3, %v410_v1  ;;  %v327_v7 = vld [vmem:[%s502_s4] ss:$0 sm:$0xff]  ;;  %vm308_vm5 = vcmask 257024   ;;  %s412_s13 = smov [#allocation3]  }
   0x9   :  { %360 = vmatprep.subr.bf16.mxu1 %v410_v1  ;;  %v238_v9 = vld [vmem:[%s501_s3] sm:$0xf]  ;;  %s316_s14 = sshll.u32 %s412_s13, 4  ;;  %s317_s14 = int_to_ptr.vmem [resolvable:$true] %s316_s14 }
   0xa   :  { %v255_v14 = vsel %vm54_vm0, %v238_v9, 0  ;;  %v387_v16 = vld [vmem:[%s500_s2] sm:$0xff]   ;;  %s388_s15 = scalar_lea.vmem %s317_s14, 128  ;;  %p393_p1 = scmp.lt.s32.totalorder %s317_s14, %s317_s14 }
   0xb   :  { %v386_v22 = vld [vmem:[%s498_s0] sm:$0xff]   ;;  %p389_p0 = scmp.ne.s32.totalorder %s317_s14, %s388_s15  ;;  %p394_p2 = scmp.lt.s32.totalorder %s388_s15, %s388_s15 }
   0xc   :  { %361 = vmatpush3.bf16.msra.mxu1 %v385_v5  ;;  %v335_v35 = vld [vmem:[%s504_s6] ss:$0 sm:$0xff] }
   0xd   :  { %372 = vmatprep.subr.bf16.mxu1 %v410_v1  ;;  %p395_p3 = por %p394_p2, %p393_p1 }
   0xf   :  { %v161_v27 = vld [vmem:[#allocation2] sm:$0xff]  ;;  %v162_v31 = vld [vmem:[#allocation2 + $0x8] sm:$0xff]  ;;  %p396_p4 = pnand %p395_p3, %p389_p0 }
  0xc6   :  { %v92_v6 = vpop.f32.mrf.mxu0 }
  0xc7   :  { %v93_v11 = vadd.f32 %v327_v7, %v92_v6 }
  0xc8   :  { %v356_v8 = vpop.f32.mrf.mxu0 }
  0xca   :  { %v95_v10 = vpop.f32.mrf.mxu0 }
  0xcb   :  { %v96_v12 = vadd.f32 %v327_v7, %v95_v10 }
  0xcc   :  { %v357_v13 = vpop.f32.mrf.mxu0 }
  0xcd   :  { %v99_v15 = vpack.c.bf16 %v96_v12, %v93_v11 }
  0xcf   :  { %363 = vmatmul.mubr.msk.bf16.vlgmr.msra.gmra.mxu1 %vm32_vm3, %v99_v15 }
  0xd0   :  { %373 = vmatpush3.bf16.msra.mxu1 %v255_v14  ;;  %374 = vmatprep.mubr.msk.bf16.mxu1 %vm411_vm1, %v410_v1 }
  0xd7   :  { %375 = vmatmul.mubr.msk.bf16.vlgmr.msra.gmra.mxu1 %vm50_vm2, %v387_v16 }
 0x18f   :  { %v154_v17 = vpop.f32.mrf.mxu1 }
 0x191   :  { %v364_v18 = vpop.f32.mrf.mxu1 }
 0x193   :  { %v157_v19 = vpop.f32.mrf.mxu1 }
 0x194   :  { %v165_v20 = vpack.c.bf16 %v157_v19, %v154_v17 }
 0x195   :  { %v365_v21 = vpop.f32.mrf.mxu1 }
 0x196   :  { %367 = vmatpush3.bf16.msra.mxu0 %v165_v20 }
 0x197   :  { %v291_v23 = vpop.f32.mrf.mxu1 }
 0x198   :  { %v292_v38 = vadd.f32 %v327_v7, %v291_v23 }
 0x199   :  { %369 = vmatmul.mubr.msk.bf16.vlgmr.msra.gmra.mxu0 %vm171_vm4, %v386_v22  ;;  %v376_v24 = vpop.f32.mrf.mxu1 }
 0x19b   :  { %v294_v25 = vpop.f32.mrf.mxu1 }
 0x19c   :  { %v295_v45 = vadd.f32 %v327_v7, %v294_v25 }
 0x19d   :  { %v377_v26 = vpop.f32.mrf.mxu1 }
 0x259   :  { %v209_v28 = vpop.f32.mrf.mxu0 }
 0x25a   :  { %v216_v29 = vadd.f32 %v209_v28, %v161_v27 }
 0x25b   :  { %v370_v30 = vpop.f32.mrf.mxu0 }
 0x25c   :  { %218 = vst.msk [vmem:[#allocation2] sm:$0xff] %vm32_vm3, %v216_v29 }
 0x25d   :  { %v212_v32 = vpop.f32.mrf.mxu0 }
 0x25e   :  { %v217_v33 = vadd.f32 %v212_v32, %v162_v31 }
 0x25f   :  { %v371_v34 = vpop.f32.mrf.mxu0 }
 0x260   :  { %219 = vst.msk [vmem:[#allocation2 + $0x8] sm:$0xff] %vm32_vm3, %v217_v33 }
 0x263   :  { %v223_v36 = vld [vmem:[#allocation2] sm:$0xff] }
 0x264   :  { %v232_v37 = vadd.f32 %v335_v35, %v223_v36 }
 0x266   :  { %v234_v39 = vmax.f32 %v232_v37, 0.0 }
 0x267   :  { %v224_v40 = vld [vmem:[#allocation2 + $0x8] sm:$0xff] }
 0x268   :  { %v298_v41 = vadd.f32 %v292_v38, %v234_v39  ;;  %v233_v42 = vadd.f32 %v335_v35, %v224_v40 }
 0x26a   :  { %v341_v43 = vpack.c.bf16 %v298_v41, %v298_v41  ;;  %v235_v44 = vmax.f32 %v233_v42, 0.0 }
 0x26c   :  { %309 = vst.msk [vmem:[#allocation3] sm:$0xf] %vm308_vm5, %v341_v43  ;;  %v299_v46 = vadd.f32 %v295_v45, %v235_v44 }
 0x26e   :  { %v342_v47 = vpack.c.bf16 %v299_v46, %v299_v46 }
 0x270   :  { %310 = vst.msk [vmem:[#allocation3 + $0x4] sm:$0xf] %vm308_vm5, %v342_v47 }
 0x271   :  { %399 = shalt.err (!%p396_p4)
}
 0x272   :  { %s413_s6 = smov 64   ;;  %s414_s16 = smov 4  }
 0x273   :  { %322 = dma.vmem_to_hbm [thread:$0]  %s317_s14, 128, %s505_s7, [#allocation4], %s413_s6, %s413_s6, %s414_s16  }
 0x274   :  { %408 = dma.done.wait [#allocation4], 128  }
 0x275   :  { %409 = vsyncadd [#allocation4], 4294967168 }
 0x276   :  { %326 = vsyncpa [#allocation4], 1 }

</bundles_post_ra>
